<compile_context>
chip_gen: v7x
topology: tpu7x:2x2x1
jax: 0.10.0
libtpu: 0.0.40
codegen_flags: <defaults>
</compile_context>

<pallas_src>
import numpy as np
import jax
import jax.numpy as jnp
from jax import lax
from jax.experimental import pallas as pl
from jax.experimental.pallas import tpu as pltpu

MFCC_DIM = 13        # matches the hard-coded torch.eye(13) in attack_cov
SPECTRAL_DIM = 24    # spectral_dim > mfcc_dim


def dct_matrix(N):
    """torch_dct.dct(x, norm=None): X_k = 2 * sum_n x_n cos(pi*(2n+1)*k/(2N))."""
    n = np.arange(N, dtype=np.float64)[None, :]
    k = np.arange(N, dtype=np.float64)[:, None]
    return 2.0 * np.cos(np.pi * (2.0 * n + 1.0) * k / (2.0 * N))


def _round_up(x, m):
    return ((x + m - 1) // m) * m


def _choose_tile(n_rows):
    """Lane tile: ~8 grid steps at large N, cap 2048, multiple of 128."""
    tn = min(2048, max(512, _round_up((n_rows + 7) // 8, 128)))
    return min(tn, _round_up(n_rows, 128))


# ----------------------------------------------------------------------------
# Pallas kernel: fused attack_mean + attack_cov(diagonal) for p AND q.
# ----------------------------------------------------------------------------
def _logaddexp(x, y):
    """log(exp(x) + exp(y)) without overflow; y broadcasts along lanes."""
    m = jnp.maximum(x, y)
    return m + jnp.log1p(jnp.exp(-jnp.abs(x - y)))


def _nt_dot(w, x):
    """w: [R, K], x: [TN, K] -> [R, TN]; contraction over the lane dim of both."""
    return lax.dot_general(w, x, dimension_numbers=(((1,), (1,)), ((), ())),
                           preferred_element_type=jnp.float32)


def _attack_pair_kernel(p_means_ref, p_covs_ref, q_means_ref, q_covs_ref,
                        w_stack_ref, w_dct_nar_ref, w_diag_ref,
                        w_idct_m_ref, w_dct2_ref, nz_p_ref, nz_m_ref,
                        p_matck_ref, p_diag_ref, q_matck_ref, q_diag_ref):
    # p/q_means: [TN, M]    f32  (native row-major rows)
    # p/q_covs:  [TN, M*M]  f32  (row-major flattened covariance per row)
    # w_stack:   [P+M, M]   f32  rows :P = Dinv_P[:, :M], rows P: = Dinv_M
    # w_dct_nar: [M, P]     f32  = D_P[:M, :]
    # w_diag:    [M, M*M]   f32  w_diag[k, i*M+j] = Dinv_M[k,i]*Dinv_M[k,j]
    # w_idct_m:  [M, M]     f32  = Dinv_M
    # w_dct2:    [M, M]     f32  = D_M ** 2
    # nz_p:      [P, 1]     f32  = noise_root (noise = exp(noise_root))
    # nz_m:      [M, 1]     f32  = noise_root[:M]
    w_stack = w_stack_ref[...]
    w_dct_nar = w_dct_nar_ref[...]
    w_diag = w_diag_ref[...]
    w_idct_m = w_idct_m_ref[...]
    w_dct2 = w_dct2_ref[...]
    nz_p = nz_p_ref[...]
    nz_m = nz_m_ref[...]
    P = nz_p.shape[0]

    def process(means_ref, covs_ref, matck_ref, diag_ref):
        means = means_ref[...]                               # [TN, M]
        covs = covs_ref[...]                                 # [TN, M*M]

        # ---- attack_mean ----
        proj = _nt_dot(w_stack, means)                       # [P+M, TN]
        log_spec = proj[:P]                                  # idct(padded means)
        idct_means = proj[P:]                                # idct(means)
        att_log = _logaddexp(log_spec, nz_p)                 # log(exp(.) + noise)
        m_atck = jnp.dot(w_dct_nar, att_log,
                         preferred_element_type=jnp.float32)  # [M, TN]
        matck_ref[...] = m_atck.astype(matck_ref.dtype)

        # ---- attack_cov (diagonal only) ----
        step3 = _nt_dot(w_diag, covs)                        # diag(Dinv C Dinv^T)
        step4 = idct_means + 0.5 * step3
        idct_matck = jnp.dot(w_idct_m, m_atck,
                             preferred_element_type=jnp.float32)
        step7 = 2.0 * _logaddexp(step4, nz_m) - 2.0 * idct_matck
        diag10 = jnp.dot(w_dct2, step7,
                         preferred_element_type=jnp.float32)  # diag(D diag(.) D^T)
        diag_ref[...] = (jnp.maximum(diag10, 1.0) + 0.01).astype(diag_ref.dtype)

    process(p_means_ref, p_covs_ref, p_matck_ref, p_diag_ref)
    process(q_means_ref, q_covs_ref, q_matck_ref, q_diag_ref)


# ----------------------------------------------------------------------------
# Wrapper
# ----------------------------------------------------------------------------
def attack_all_pallas(noise_root, p_means, p_covs, q_means, q_covs):
    S, F, M = p_means.shape
    P = noise_root.shape[0]
    MM = M * M
    N1 = S * F

    # Constant DCT / inverse-DCT operators (float64 glue, folded to constants).
    D_P = dct_matrix(P)
    Dinv_P = np.linalg.inv(D_P)
    D_M = dct_matrix(M)
    Dinv_M = np.linalg.inv(D_M)

    w_stack = jnp.asarray(np.concatenate([Dinv_P[:, :M], Dinv_M], axis=0),
                          jnp.float32)                                    # [P+M, M]
    w_dct_nar = jnp.asarray(D_P[:M, :], jnp.float32)                      # [M, P]
    w_diag = jnp.asarray(
        np.einsum('ki,kj->kij', Dinv_M, Dinv_M).reshape(M, MM),
        jnp.float32)                                                      # [M, M*M]
    w_idct_m = jnp.asarray(Dinv_M, jnp.float32)                           # [M, M]
    w_dct2 = jnp.asarray(D_M ** 2, jnp.float32)                           # [M, M]
    nz_p = jnp.asarray(noise_root, jnp.float32).reshape(P, 1)             # [P, 1]
    nz_m = nz_p[:M]                                                       # [M, 1]

    # Native layouts: free reshapes only — no concat / transpose / cast / pad.
    pm = p_means.reshape(N1, M).astype(jnp.float32)                       # [N1, M]
    qm = q_means.reshape(N1, M).astype(jnp.float32)
    pc = p_covs.reshape(N1, MM).astype(jnp.float32)                       # [N1, M*M]
    qc = q_covs.reshape(N1, MM).astype(jnp.float32)

    TN = _choose_tile(N1)
    grid = pl.cdiv(N1, TN)          # ragged last tile handled by Pallas masking

    def row_spec(cols):             # rows on sublanes, full feature width on lanes
        return pl.BlockSpec((TN, cols), lambda i: (i, 0))

    def lane_spec():                # lane-dense output: rows on lanes
        return pl.BlockSpec((M, TN), lambda i: (0, i))

    def pinned(shape):              # constants: same block every step (no re-DMA)
        return pl.BlockSpec(shape, lambda i: (0, 0))

    out_sd = jax.ShapeDtypeStruct((M, N1), jnp.float32)
    p_matck_t, p_diag_t, q_matck_t, q_diag_t = pl.pallas_call(
        _attack_pair_kernel,
        out_shape=(out_sd, out_sd, out_sd, out_sd),
        grid_spec=pltpu.PrefetchScalarGridSpec(
            num_scalar_prefetch=0,
            grid=(grid,),
            in_specs=[row_spec(M), row_spec(MM), row_spec(M), row_spec(MM),
                      pinned((P + M, M)), pinned((M, P)), pinned((M, MM)),
                      pinned((M, M)), pinned((M, M)),
                      pinned((P, 1)), pinned((M, 1))],
            out_specs=[lane_spec(), lane_spec(), lane_spec(), lane_spec()]),
        compiler_params=pltpu.CompilerParams(
            dimension_semantics=("parallel",),
            vmem_limit_bytes=48 * 1024 * 1024),
    )(pm, pc, qm, qc, w_stack, w_dct_nar, w_diag, w_idct_m, w_dct2, nz_p, nz_m)

    # Tiny [13, N] -> [N, 13] transposes (52 B/row) stay in XLA; diag transpose
    # fuses into the diag-embed in the caller.
    p_m_atck = p_matck_t.T.reshape(S, F, M)
    q_m_atck = q_matck_t.T.reshape(S, F, M)
    p_diag = p_diag_t.T.reshape(S, F, M)
    q_diag = q_diag_t.T.reshape(S, F, M)
    return p_m_atck, q_m_atck, p_diag, q_diag


def spectral_attack_lognormal_forward(noise_root, p_means, p_covs, q_means,
                                      q_covs, num_phones_mask):
    """Attack path of Spectral_attack_lognormal.forward."""
    M = p_means.shape[-1]
    p_m_atck, q_m_atck, p_diag, q_diag = attack_all_pallas(
        noise_root, p_means, p_covs, q_means, q_covs)
    # Diag-embed outside the kernel (13x less HBM writeback inside the kernel);
    # XLA fuses the transpose of the lane-dense diag into this broadcast.
    eye = jnp.eye(M, dtype=jnp.float32)
    p_covs_atck = p_diag[..., :, None] * eye
    q_covs_atck = q_diag[..., :, None] * eye
    # TODO(synk): torch.load(trained_model_path) + trained_model(...) + clamp(0, 6)
    # (the only consumer of num_phones_mask) cannot be reproduced without the
    # checkpoint; returning the attacked statistics instead.
    return p_m_atck, p_covs_atck, q_m_atck, q_covs_atck


# ----------------------------------------------------------------------------
# Pure-JAX reference (for correctness check)
# ----------------------------------------------------------------------------
def _ref_attack_mean(means, noise, Dinv_P, D_P):
    S, F, M = means.shape
    P = Dinv_P.shape[0]
    padded = jnp.concatenate([means, jnp.zeros((S, F, P - M), means.dtype)], axis=2)
    log_spec = padded @ jnp.asarray(Dinv_P.T, jnp.float32)
    attacked = jnp.log(jnp.exp(log_spec) + noise)
    return (attacked @ jnp.asarray(D_P.T, jnp.float32))[..., :M]


def _ref_attack_cov(means, covs, means_atck, noise, Dinv_M, D_M):
    M = means.shape[-1]
    B = jnp.asarray(Dinv_M, jnp.float32)
    D = jnp.asarray(D_M, jnp.float32)
    step2 = jnp.einsum('ki,sfij,lj->sfkl', B, covs, B)
    step3 = jnp.diagonal(step2, axis1=-2, axis2=-1)
    step4 = means @ B.T + 0.5 * step3
    step7 = 2.0 * jnp.log(jnp.exp(step4) + noise[:M]) - 2.0 * (means_atck @ B.T)
    diag10 = step7 @ (D ** 2).T
    diag_vals = jnp.maximum(diag10, 1.0) + 0.01
    return diag_vals[..., :, None] * jnp.eye(M, dtype=jnp.float32)


if __name__ == "__main__":
    S, F, M, P = 2, 8, MFCC_DIM, SPECTRAL_DIM
    key = jax.random.PRNGKey(0)
    k1, k2, k3, k4, k5 = jax.random.split(key, 5)

    p_means = 0.1 * jax.random.normal(k1, (S, F, M), jnp.float32)
    q_means = 0.1 * jax.random.normal(k2, (S, F, M), jnp.float32)
    a = 0.1 * jax.random.normal(k3, (S, F, M, M), jnp.float32)
    b = 0.1 * jax.random.normal(k4, (S, F, M, M), jnp.float32)
    p_covs = jnp.einsum('sfij,sfkj->sfik', a, a) + 0.1 * jnp.eye(M, dtype=jnp.float32)
    q_covs = jnp.einsum('sfij,sfkj->sfik', b, b) + 0.1 * jnp.eye(M, dtype=jnp.float32)
    num_phones_mask = jnp.ones((S, F), jnp.float32)

    # Deterministic parameter init (torch.nn.Parameter(init_root)).
    noise_root = 0.1 * jax.random.normal(k5, (P,), jnp.float32)

    fwd = jax.jit(spectral_attack_lognormal_forward)
    outs = fwd(noise_root, p_means, p_covs, q_means, q_covs, num_phones_mask)
    outs = jax.block_until_ready(outs)
    p_means_atck, p_covs_atck, q_means_atck, q_covs_atck = outs

    # Verify against a plain-JAX reference of the same math (all-f32 path now,
    # so the tolerance is tightened vs. the earlier bf16-covs version).
    D_P = dct_matrix(P); Dinv_P = np.linalg.inv(D_P)
    D_M = dct_matrix(M); Dinv_M = np.linalg.inv(D_M)
    noise = jnp.exp(noise_root)
    with jax.default_matmul_precision('highest'):
        ref_pm = _ref_attack_mean(p_means, noise, Dinv_P, D_P)
        ref_qm = _ref_attack_mean(q_means, noise, Dinv_P, D_P)
        ref_pc = _ref_attack_cov(p_means, p_covs, ref_pm, noise, Dinv_M, D_M)
        ref_qc = _ref_attack_cov(q_means, q_covs, ref_qm, noise, Dinv_M, D_M)
    np.testing.assert_allclose(np.asarray(p_means_atck), np.asarray(ref_pm), rtol=3e-3, atol=3e-3)
    np.testing.assert_allclose(np.asarray(q_means_atck), np.asarray(ref_qm), rtol=3e-3, atol=3e-3)
    np.testing.assert_allclose(np.asarray(p_covs_atck), np.asarray(ref_pc), rtol=3e-3, atol=3e-3)
    np.testing.assert_allclose(np.asarray(q_covs_atck), np.asarray(ref_qc), rtol=3e-3, atol=3e-3)

    print("KERNEL_OK")
</pallas_src>

<mosaic_0001>
module attributes {stable_mosaic.version = 11 : i64} {
  func.func @_attack_pair_kernel(%arg0: i32, %arg1: memref<128x13xf32, #tpu.memory_space<vmem>>, %arg2: memref<128x169xf32, #tpu.memory_space<vmem>>, %arg3: memref<128x13xf32, #tpu.memory_space<vmem>>, %arg4: memref<128x169xf32, #tpu.memory_space<vmem>>, %arg5: memref<37x13xf32, #tpu.memory_space<vmem>>, %arg6: memref<13x24xf32, #tpu.memory_space<vmem>>, %arg7: memref<13x169xf32, #tpu.memory_space<vmem>>, %arg8: memref<13x13xf32, #tpu.memory_space<vmem>>, %arg9: memref<13x13xf32, #tpu.memory_space<vmem>>, %arg10: memref<24x1xf32, #tpu.memory_space<vmem>>, %arg11: memref<13x1xf32, #tpu.memory_space<vmem>>, %arg12: memref<13x128xf32, #tpu.memory_space<vmem>>, %arg13: memref<13x128xf32, #tpu.memory_space<vmem>>, %arg14: memref<13x128xf32, #tpu.memory_space<vmem>>, %arg15: memref<13x128xf32, #tpu.memory_space<vmem>>) attributes {dimension_semantics = [#tpu.dimension_semantics<parallel>], iteration_bounds = array<i64: 1>, scalar_prefetch = 0 : i64, scratch_operands = 0 : i64, tpu.core_type = #tpu.core_type<tc>, window_params = [{transform_indices = @transform_0, window_bounds = array<i64: 128, 13>}, {transform_indices = @transform_1, window_bounds = array<i64: 128, 169>}, {transform_indices = @transform_2, window_bounds = array<i64: 128, 13>}, {transform_indices = @transform_3, window_bounds = array<i64: 128, 169>}, {pipeline_mode = #tpu.pipeline_mode<synchronous>, transform_indices = @transform_4, window_bounds = array<i64: 37, 13>}, {pipeline_mode = #tpu.pipeline_mode<synchronous>, transform_indices = @transform_5, window_bounds = array<i64: 13, 24>}, {pipeline_mode = #tpu.pipeline_mode<synchronous>, transform_indices = @transform_6, window_bounds = array<i64: 13, 169>}, {pipeline_mode = #tpu.pipeline_mode<synchronous>, transform_indices = @transform_7, window_bounds = array<i64: 13, 13>}, {pipeline_mode = #tpu.pipeline_mode<synchronous>, transform_indices = @transform_8, window_bounds = array<i64: 13, 13>}, {pipeline_mode = #tpu.pipeline_mode<synchronous>, transform_indices = @transform_9, window_bounds = array<i64: 24, 1>}, {pipeline_mode = #tpu.pipeline_mode<synchronous>, transform_indices = @transform_10, window_bounds = array<i64: 13, 1>}, {transform_indices = @transform_11, window_bounds = array<i64: 13, 128>}, {transform_indices = @transform_12, window_bounds = array<i64: 13, 128>}, {transform_indices = @transform_13, window_bounds = array<i64: 13, 128>}, {transform_indices = @transform_14, window_bounds = array<i64: 13, 128>}]} {
    %c0 = arith.constant 0 : index
    %c0_0 = arith.constant 0 : index
    %0 = vector.load %arg5[%c0, %c0_0] : memref<37x13xf32, #tpu.memory_space<vmem>>, vector<37x13xf32>
    %c0_1 = arith.constant 0 : index
    %c0_2 = arith.constant 0 : index
    %1 = vector.load %arg6[%c0_1, %c0_2] : memref<13x24xf32, #tpu.memory_space<vmem>>, vector<13x24xf32>
    %c0_3 = arith.constant 0 : index
    %c0_4 = arith.constant 0 : index
    %2 = vector.load %arg7[%c0_3, %c0_4] : memref<13x169xf32, #tpu.memory_space<vmem>>, vector<13x169xf32>
    %c0_5 = arith.constant 0 : index
    %c0_6 = arith.constant 0 : index
    %3 = vector.load %arg8[%c0_5, %c0_6] : memref<13x13xf32, #tpu.memory_space<vmem>>, vector<13x13xf32>
    %c0_7 = arith.constant 0 : index
    %c0_8 = arith.constant 0 : index
    %4 = vector.load %arg9[%c0_7, %c0_8] : memref<13x13xf32, #tpu.memory_space<vmem>>, vector<13x13xf32>
    %c0_9 = arith.constant 0 : index
    %c0_10 = arith.constant 0 : index
    %5 = vector.load %arg10[%c0_9, %c0_10] : memref<24x1xf32, #tpu.memory_space<vmem>>, vector<24x1xf32>
    %c0_11 = arith.constant 0 : index
    %c0_12 = arith.constant 0 : index
    %6 = vector.load %arg11[%c0_11, %c0_12] : memref<13x1xf32, #tpu.memory_space<vmem>>, vector<13x1xf32>
    %c0_13 = arith.constant 0 : index
    %c0_14 = arith.constant 0 : index
    %7 = vector.load %arg1[%c0_13, %c0_14] : memref<128x13xf32, #tpu.memory_space<vmem>>, vector<128x13xf32>
    %c0_15 = arith.constant 0 : index
    %c0_16 = arith.constant 0 : index
    %8 = vector.load %arg2[%c0_15, %c0_16] : memref<128x169xf32, #tpu.memory_space<vmem>>, vector<128x169xf32>
    %cst = arith.constant dense<0.000000e+00> : vector<37x128xf32>
    %9 = tpu.matmul %0, %7, %cst {dimension_numbers = #tpu.dot_dimension_numbers<[1], [1], [0], [0], [0, 0, 1, 0], [], []>} : vector<37x13xf32>, vector<128x13xf32>, vector<37x128xf32> -> vector<37x128xf32>
    %10 = vector.extract_strided_slice %9 {offsets = [0, 0], sizes = [24, 128], strides = [1, 1]} : vector<37x128xf32> to vector<24x128xf32>
    %11 = vector.extract_strided_slice %9 {offsets = [24, 0], sizes = [13, 128], strides = [1, 1]} : vector<37x128xf32> to vector<13x128xf32>
    %12 = vector.broadcast %5 : vector<24x1xf32> to vector<24x128xf32>
    %13 = arith.maximumf %10, %12 : vector<24x128xf32>
    %14 = vector.broadcast %5 : vector<24x1xf32> to vector<24x128xf32>
    %15 = arith.subf %10, %14 : vector<24x128xf32>
    %16 = math.absf %15 : vector<24x128xf32>
    %cst_17 = arith.constant 0.000000e+00 : f32
    %17 = vector.broadcast %cst_17 : f32 to vector<24x128xf32>
    %18 = arith.subf %17, %16 : vector<24x128xf32>
    %19 = math.exp %18 : vector<24x128xf32>
    %20 = math.log1p %19 : vector<24x128xf32>
    %21 = arith.addf %13, %20 : vector<24x128xf32>
    %cst_18 = arith.constant dense<0.000000e+00> : vector<13x128xf32>
    %22 = tpu.matmul %1, %21, %cst_18 {dimension_numbers = #tpu.dot_dimension_numbers<[1], [0], [0], [1], [0, 0, 1, 1], [], []>} : vector<13x24xf32>, vector<24x128xf32>, vector<13x128xf32> -> vector<13x128xf32>
    %c0_19 = arith.constant 0 : index
    %c0_20 = arith.constant 0 : index
    %23 = vector.load %arg12[%c0_19, %c0_20] : memref<13x128xf32, #tpu.memory_space<vmem>>, vector<13x128xf32>
    tpu.vector_store %arg12[%c0_19, %c0_20], %22 {strides = array<i32>} : memref<13x128xf32, #tpu.memory_space<vmem>>, vector<13x128xf32>,
    %cst_21 = arith.constant dense<0.000000e+00> : vector<13x128xf32>
    %24 = tpu.matmul %2, %8, %cst_21 {dimension_numbers = #tpu.dot_dimension_numbers<[1], [1], [0], [0], [0, 0, 1, 0], [], []>} : vector<13x169xf32>, vector<128x169xf32>, vector<13x128xf32> -> vector<13x128xf32>
    %cst_22 = arith.constant 5.000000e-01 : f32
    %25 = vector.broadcast %cst_22 : f32 to vector<13x128xf32>
    %26 = arith.mulf %25, %24 : vector<13x128xf32>
    %27 = arith.addf %11, %26 : vector<13x128xf32>
    %cst_23 = arith.constant dense<0.000000e+00> : vector<13x128xf32>
    %28 = tpu.matmul %3, %22, %cst_23 {dimension_numbers = #tpu.dot_dimension_numbers<[1], [0], [0], [1], [0, 0, 1, 1], [], []>} : vector<13x13xf32>, vector<13x128xf32>, vector<13x128xf32> -> vector<13x128xf32>
    %29 = vector.broadcast %6 : vector<13x1xf32> to vector<13x128xf32>
    %30 = arith.maximumf %27, %29 : vector<13x128xf32>
    %31 = vector.broadcast %6 : vector<13x1xf32> to vector<13x128xf32>
    %32 = arith.subf %27, %31 : vector<13x128xf32>
    %33 = math.absf %32 : vector<13x128xf32>
    %cst_24 = arith.constant 0.000000e+00 : f32
    %34 = vector.broadcast %cst_24 : f32 to vector<13x128xf32>
    %35 = arith.subf %34, %33 : vector<13x128xf32>
    %36 = math.exp %35 : vector<13x128xf32>
    %37 = math.log1p %36 : vector<13x128xf32>
    %38 = arith.addf %30, %37 : vector<13x128xf32>
    %cst_25 = arith.constant 2.000000e+00 : f32
    %39 = vector.broadcast %cst_25 : f32 to vector<13x128xf32>
    %40 = arith.mulf %39, %38 : vector<13x128xf32>
    %cst_26 = arith.constant 2.000000e+00 : f32
    %41 = vector.broadcast %cst_26 : f32 to vector<13x128xf32>
    %42 = arith.mulf %41, %28 : vector<13x128xf32>
    %43 = arith.subf %40, %42 : vector<13x128xf32>
    %cst_27 = arith.constant dense<0.000000e+00> : vector<13x128xf32>
    %44 = tpu.matmul %4, %43, %cst_27 {dimension_numbers = #tpu.dot_dimension_numbers<[1], [0], [0], [1], [0, 0, 1, 1], [], []>} : vector<13x13xf32>, vector<13x128xf32>, vector<13x128xf32> -> vector<13x128xf32>
    %cst_28 = arith.constant 1.000000e+00 : f32
    %45 = vector.broadcast %cst_28 : f32 to vector<13x128xf32>
    %46 = arith.maximumf %44, %45 : vector<13x128xf32>
    %cst_29 = arith.constant 0.00999999977 : f32
    %47 = vector.broadcast %cst_29 : f32 to vector<13x128xf32>
    %48 = arith.addf %46, %47 : vector<13x128xf32>
    %c0_30 = arith.constant 0 : index
    %c0_31 = arith.constant 0 : index
    %49 = vector.load %arg13[%c0_30, %c0_31] : memref<13x128xf32, #tpu.memory_space<vmem>>, vector<13x128xf32>
    tpu.vector_store %arg13[%c0_30, %c0_31], %48 {strides = array<i32>} : memref<13x128xf32, #tpu.memory_space<vmem>>, vector<13x128xf32>,
    %c0_32 = arith.constant 0 : index
    %c0_33 = arith.constant 0 : index
    %50 = vector.load %arg3[%c0_32, %c0_33] : memref<128x13xf32, #tpu.memory_space<vmem>>, vector<128x13xf32>
    %c0_34 = arith.constant 0 : index
    %c0_35 = arith.constant 0 : index
    %51 = vector.load %arg4[%c0_34, %c0_35] : memref<128x169xf32, #tpu.memory_space<vmem>>, vector<128x169xf32>
    %cst_36 = arith.constant dense<0.000000e+00> : vector<37x128xf32>
    %52 = tpu.matmul %0, %50, %cst_36 {dimension_numbers = #tpu.dot_dimension_numbers<[1], [1], [0], [0], [0, 0, 1, 0], [], []>} : vector<37x13xf32>, vector<128x13xf32>, vector<37x128xf32> -> vector<37x128xf32>
    %53 = vector.extract_strided_slice %52 {offsets = [0, 0], sizes = [24, 128], strides = [1, 1]} : vector<37x128xf32> to vector<24x128xf32>
    %54 = vector.extract_strided_slice %52 {offsets = [24, 0], sizes = [13, 128], strides = [1, 1]} : vector<37x128xf32> to vector<13x128xf32>
    %55 = vector.broadcast %5 : vector<24x1xf32> to vector<24x128xf32>
    %56 = arith.maximumf %53, %55 : vector<24x128xf32>
    %57 = vector.broadcast %5 : vector<24x1xf32> to vector<24x128xf32>
    %58 = arith.subf %53, %57 : vector<24x128xf32>
    %59 = math.absf %58 : vector<24x128xf32>
    %cst_37 = arith.constant 0.000000e+00 : f32
    %60 = vector.broadcast %cst_37 : f32 to vector<24x128xf32>
    %61 = arith.subf %60, %59 : vector<24x128xf32>
    %62 = math.exp %61 : vector<24x128xf32>
    %63 = math.log1p %62 : vector<24x128xf32>
    %64 = arith.addf %56, %63 : vector<24x128xf32>
    %cst_38 = arith.constant dense<0.000000e+00> : vector<13x128xf32>
    %65 = tpu.matmul %1, %64, %cst_38 {dimension_numbers = #tpu.dot_dimension_numbers<[1], [0], [0], [1], [0, 0, 1, 1], [], []>} : vector<13x24xf32>, vector<24x128xf32>, vector<13x128xf32> -> vector<13x128xf32>
    %c0_39 = arith.constant 0 : index
    %c0_40 = arith.constant 0 : index
    %66 = vector.load %arg14[%c0_39, %c0_40] : memref<13x128xf32, #tpu.memory_space<vmem>>, vector<13x128xf32>
    tpu.vector_store %arg14[%c0_39, %c0_40], %65 {strides = array<i32>} : memref<13x128xf32, #tpu.memory_space<vmem>>, vector<13x128xf32>,
    %cst_41 = arith.constant dense<0.000000e+00> : vector<13x128xf32>
    %67 = tpu.matmul %2, %51, %cst_41 {dimension_numbers = #tpu.dot_dimension_numbers<[1], [1], [0], [0], [0, 0, 1, 0], [], []>} : vector<13x169xf32>, vector<128x169xf32>, vector<13x128xf32> -> vector<13x128xf32>
    %cst_42 = arith.constant 5.000000e-01 : f32
    %68 = vector.broadcast %cst_42 : f32 to vector<13x128xf32>
    %69 = arith.mulf %68, %67 : vector<13x128xf32>
    %70 = arith.addf %54, %69 : vector<13x128xf32>
    %cst_43 = arith.constant dense<0.000000e+00> : vector<13x128xf32>
    %71 = tpu.matmul %3, %65, %cst_43 {dimension_numbers = #tpu.dot_dimension_numbers<[1], [0], [0], [1], [0, 0, 1, 1], [], []>} : vector<13x13xf32>, vector<13x128xf32>, vector<13x128xf32> -> vector<13x128xf32>
    %72 = vector.broadcast %6 : vector<13x1xf32> to vector<13x128xf32>
    %73 = arith.maximumf %70, %72 : vector<13x128xf32>
    %74 = vector.broadcast %6 : vector<13x1xf32> to vector<13x128xf32>
    %75 = arith.subf %70, %74 : vector<13x128xf32>
    %76 = math.absf %75 : vector<13x128xf32>
    %cst_44 = arith.constant 0.000000e+00 : f32
    %77 = vector.broadcast %cst_44 : f32 to vector<13x128xf32>
    %78 = arith.subf %77, %76 : vector<13x128xf32>
    %79 = math.exp %78 : vector<13x128xf32>
    %80 = math.log1p %79 : vector<13x128xf32>
    %81 = arith.addf %73, %80 : vector<13x128xf32>
    %cst_45 = arith.constant 2.000000e+00 : f32
    %82 = vector.broadcast %cst_45 : f32 to vector<13x128xf32>
    %83 = arith.mulf %82, %81 : vector<13x128xf32>
    %cst_46 = arith.constant 2.000000e+00 : f32
    %84 = vector.broadcast %cst_46 : f32 to vector<13x128xf32>
    %85 = arith.mulf %84, %71 : vector<13x128xf32>
    %86 = arith.subf %83, %85 : vector<13x128xf32>
    %cst_47 = arith.constant dense<0.000000e+00> : vector<13x128xf32>
    %87 = tpu.matmul %4, %86, %cst_47 {dimension_numbers = #tpu.dot_dimension_numbers<[1], [0], [0], [1], [0, 0, 1, 1], [], []>} : vector<13x13xf32>, vector<13x128xf32>, vector<13x128xf32> -> vector<13x128xf32>
    %cst_48 = arith.constant 1.000000e+00 : f32
    %88 = vector.broadcast %cst_48 : f32 to vector<13x128xf32>
    %89 = arith.maximumf %87, %88 : vector<13x128xf32>
    %cst_49 = arith.constant 0.00999999977 : f32
    %90 = vector.broadcast %cst_49 : f32 to vector<13x128xf32>
    %91 = arith.addf %89, %90 : vector<13x128xf32>
    %c0_50 = arith.constant 0 : index
    %c0_51 = arith.constant 0 : index
    %92 = vector.load %arg15[%c0_50, %c0_51] : memref<13x128xf32, #tpu.memory_space<vmem>>, vector<13x128xf32>
    tpu.vector_store %arg15[%c0_50, %c0_51], %91 {strides = array<i32>} : memref<13x128xf32, #tpu.memory_space<vmem>>, vector<13x128xf32>,
    return
  }
  func.func @transform_0(%arg0: i32) -> (i32, i32) {
    %c0_i32 = arith.constant 0 : i32
    %c0_i32_0 = arith.constant 0 : i32
    return %arg0, %c0_i32 : i32, i32
  }
  func.func @transform_1(%arg0: i32) -> (i32, i32) {
    %c0_i32 = arith.constant 0 : i32
    %c0_i32_0 = arith.constant 0 : i32
    return %arg0, %c0_i32 : i32, i32
  }
  func.func @transform_2(%arg0: i32) -> (i32, i32) {
    %c0_i32 = arith.constant 0 : i32
    %c0_i32_0 = arith.constant 0 : i32
    return %arg0, %c0_i32 : i32, i32
  }
  func.func @transform_3(%arg0: i32) -> (i32, i32) {
    %c0_i32 = arith.constant 0 : i32
    %c0_i32_0 = arith.constant 0 : i32
    return %arg0, %c0_i32 : i32, i32
  }
  func.func @transform_4(%arg0: i32) -> (i32, i32) {
    %c0_i32 = arith.constant 0 : i32
    %c0_i32_0 = arith.constant 0 : i32
    %c0_i32_1 = arith.constant 0 : i32
    return %c0_i32, %c0_i32_0 : i32, i32
  }
  func.func @transform_5(%arg0: i32) -> (i32, i32) {
    %c0_i32 = arith.constant 0 : i32
    %c0_i32_0 = arith.constant 0 : i32
    %c0_i32_1 = arith.constant 0 : i32
    return %c0_i32, %c0_i32_0 : i32, i32
  }
  func.func @transform_6(%arg0: i32) -> (i32, i32) {
    %c0_i32 = arith.constant 0 : i32
    %c0_i32_0 = arith.constant 0 : i32
    %c0_i32_1 = arith.constant 0 : i32
    return %c0_i32, %c0_i32_0 : i32, i32
  }
  func.func @transform_7(%arg0: i32) -> (i32, i32) {
    %c0_i32 = arith.constant 0 : i32
    %c0_i32_0 = arith.constant 0 : i32
    %c0_i32_1 = arith.constant 0 : i32
    return %c0_i32, %c0_i32_0 : i32, i32
  }
  func.func @transform_8(%arg0: i32) -> (i32, i32) {
    %c0_i32 = arith.constant 0 : i32
    %c0_i32_0 = arith.constant 0 : i32
    %c0_i32_1 = arith.constant 0 : i32
    return %c0_i32, %c0_i32_0 : i32, i32
  }
  func.func @transform_9(%arg0: i32) -> (i32, i32) {
    %c0_i32 = arith.constant 0 : i32
    %c0_i32_0 = arith.constant 0 : i32
    %c0_i32_1 = arith.constant 0 : i32
    return %c0_i32, %c0_i32_0 : i32, i32
  }
  func.func @transform_10(%arg0: i32) -> (i32, i32) {
    %c0_i32 = arith.constant 0 : i32
    %c0_i32_0 = arith.constant 0 : i32
    %c0_i32_1 = arith.constant 0 : i32
    return %c0_i32, %c0_i32_0 : i32, i32
  }
  func.func @transform_11(%arg0: i32) -> (i32, i32) {
    %c0_i32 = arith.constant 0 : i32
    %c0_i32_0 = arith.constant 0 : i32
    return %c0_i32, %arg0 : i32, i32
  }
  func.func @transform_12(%arg0: i32) -> (i32, i32) {
    %c0_i32 = arith.constant 0 : i32
    %c0_i32_0 = arith.constant 0 : i32
    return %c0_i32, %arg0 : i32, i32
  }
  func.func @transform_13(%arg0: i32) -> (i32, i32) {
    %c0_i32 = arith.constant 0 : i32
    %c0_i32_0 = arith.constant 0 : i32
    return %c0_i32, %arg0 : i32, i32
  }
  func.func @transform_14(%arg0: i32) -> (i32, i32) {
    %c0_i32 = arith.constant 0 : i32
    %c0_i32_0 = arith.constant 0 : i32
    return %c0_i32, %arg0 : i32, i32
  }
}

</mosaic_0001>

<bundles_post_ra>
// kernel: spectral_attack_lognormal_forward.1
= control target key start
LH: loop header
LB: loop body
LE: loop exit
PB: predicated region body
PF: predicated region fallthrough
CT: control target
= control target key end

     0   :  { %vm110_vm0 = vcmask 105472   ;;  %v1947_v0 = vmov 0.0|0.0   ;;  %vm1948_vm2 = vmmov 0   ;;  %v1949_v4 = vmov 0.0   ;;  %s2645_s0 = inlined_call_operand.vmem [shape: f32[16,13], index: 0, kind: input, shape index: {}]   ;;  %s2646_s9 = inlined_call_operand.vmem [shape: f32[24,1], index: 9, kind: input, shape index: {}]   ;;  %s2647_s10 = inlined_call_operand.vmem [shape: f32[13,1], index: 10, kind: input, shape index: {}]   ;;  %s2648_s2 = inlined_call_operand.vmem [shape: f32[16,13], index: 2, kind: input, shape index: {}]   ;;  %s2649_s4 = inlined_call_operand.vmem [shape: f32[37,13], index: 4, kind: input, shape index: {}]   ;;  %s2650_s5 = inlined_call_operand.vmem [shape: f32[13,24], index: 5, kind: input, shape index: {}]   ;;  %s2651_s1 = inlined_call_operand.vmem [shape: f32[16,169], index: 1, kind: input, shape index: {}]   ;;  %s2652_s6 = inlined_call_operand.vmem [shape: f32[13,169], index: 6, kind: input, shape index: {}]   ;;  %s2653_s7 = inlined_call_operand.vmem [shape: f32[13,13], index: 7, kind: input, shape index: {}]   ;;  %s2654_s11 = inlined_call_operand.vmem [shape: f32[13,16], index: 11, kind: output, shape index: {0}]   ;;  %s2655_s8 = inlined_call_operand.vmem [shape: f32[13,13], index: 8, kind: input, shape index: {}]   ;;  %s2656_s3 = inlined_call_operand.vmem [shape: f32[16,169], index: 3, kind: input, shape index: {}]   ;;  %s2657_s12 = inlined_call_operand.vmem [shape: f32[13,16], index: 12, kind: output, shape index: {1}]   ;;  %s2658_s13 = inlined_call_operand.vmem [shape: f32[13,16], index: 13, kind: output, shape index: {2}]   ;;  %s2659_s14 = inlined_call_operand.vmem [shape: f32[13,16], index: 14, kind: output, shape index: {3}]  }
   0x1   :  { %1724 = vmatprep.subr.bf16.mxu0 %v1947_v0  ;;  %v62_v1 = vld [vmem:[%s2645_s0] sm:$0xff]  ;;  %v63_v2 = vld [vmem:[%s2645_s0 + $0x8] sm:$0xff]  ;;  %vm2036_vm1 = vmpackc.low %vm110_vm0, %vm110_vm0  ;;  %1616 = vmatprep.mubr.msk.f32.mxu0 %vm1948_vm2, %v1949_v4  ;;  %v1950_v9 = vmov 0   ;;  %vm327_vm3 = vcmask 195584   ;;  %vm411_vm7 = vcmask 334848   ;;  %vm551_vm11 = vcmask 1044480  }
   0x2   :  { %v1725_v5 = vpack.c.bf16 %v63_v2, %v62_v1  ;;  %v64_v6 = vld [vmem:[%s2645_s0 + $0x10] sm:$0xff]  ;;  %v65_v7 = vld [vmem:[%s2645_s0 + $0x18] sm:$0xff]  ;;  %1905 = vset.pattern.permute.xlu0 %v1950_v9  ;;  %v66_v10 = vld [vmem:[%s2645_s0 + $0x20] sm:$0xff]  ;;  %1906 = vset.pattern.permute.xlu1 %v1950_v9  ;;  %vm1951_vm12 = vmmov 1  }
   0x3   :  { %v1729_v8 = vpack.c.bf16 %v65_v7, %v64_v6  ;;  %v67_v11 = vld [vmem:[%s2645_s0 + $0x28] sm:$0xff]  ;;  %v57_v12 = vld [vmem:[%s2646_s9] sm:$0xff]  ;;  %v59_v13 = vld [vmem:[%s2646_s9 + $0x10] sm:$0xff] }
   0x4   :  { %1727 = vmatpush3.bf16.xpose.msk.msra.mxu0 %vm2036_vm1, %v1725_v5  ;;  %266 = vperm.xlu0 %1905, %v57_v12   ;;  %v58_v14 = vld [vmem:[%s2646_s9 + $0x8] sm:$0xff]  ;;  %v1733_v15 = vpack.c.bf16 %v67_v11, %v66_v10  ;;  %v60_v16 = vld [vmem:[%s2647_s10] sm:$0xff]  ;;  %v68_v18 = vld [vmem:[%s2645_s0 + $0x30] sm:$0xff] }
   0x5   :  { %1728 = vmatprep.subr.bf16.mxu0 %v1947_v0  ;;  %276 = vperm.xlu1 %1906, %v59_v13   ;;  %v61_v17 = vld [vmem:[%s2647_s10 + $0x8] sm:$0x1f]  ;;  %v69_v19 = vld [vmem:[%s2645_s0 + $0x38] sm:$0xff]  ;;  %v70_v21 = vld [vmem:[%s2645_s0 + $0x40] sm:$0xff] }
   0x6   :  { %v1737_v20 = vpack.c.bf16 %v69_v19, %v68_v18  ;;  %v71_v22 = vld [vmem:[%s2645_s0 + $0x48] sm:$0xff]  ;;  %v72_v24 = vld [vmem:[%s2645_s0 + $0x50] sm:$0xff]  ;;  %v73_v25 = vld [vmem:[%s2645_s0 + $0x58] sm:$0xff] }
   0x7   :  { %v1741_v23 = vpack.c.bf16 %v71_v22, %v70_v21  ;;  %v1745_v26 = vpack.c.bf16 %v73_v25, %v72_v24  ;;  %v74_v27 = vld [vmem:[%s2645_s0 + $0x60] sm:$0xff]  ;;  %v75_v28 = vld [vmem:[%s2645_s0 + $0x68] sm:$0xff]  ;;  %v76_v30 = vld [vmem:[%s2645_s0 + $0x70] sm:$0xff] }
   0x8   :  { %271 = vperm.xlu0 %1905, %v58_v14   ;;  %v1749_v29 = vpack.c.bf16 %v75_v28, %v74_v27  ;;  %v77_v31 = vld [vmem:[%s2645_s0 + $0x78] sm:$0xff]  ;;  %v768_v33 = vld [vmem:[%s2648_s2] sm:$0xff]  ;;  %v769_v34 = vld [vmem:[%s2648_s2 + $0x8] sm:$0xff] }
   0x9   :  { %632 = vperm.xlu1 %1906, %v60_v16   ;;  %v1753_v32 = vpack.c.bf16 %v77_v31, %v76_v30  ;;  %v42_v35 = vld [vmem:[%s2649_s4] sm:$0xff]  ;;  %v1813_v36 = vpack.c.bf16 %v769_v34, %v768_v33  ;;  %v43_v37 = vld [vmem:[%s2649_s4 + $0x8] sm:$0xff]  ;;  %v770_v38 = vld [vmem:[%s2648_s2 + $0x10] sm:$0xff] }
   0xa   :  { %v771_v39 = vld [vmem:[%s2648_s2 + $0x18] sm:$0xff]  ;;  %v44_v40 = vld [vmem:[%s2649_s4 + $0x10] sm:$0xff]  ;;  %v772_v43 = vld [vmem:[%s2648_s2 + $0x20] sm:$0xff] }
   0xb   :  { %v1817_v41 = vpack.c.bf16 %v771_v39, %v770_v38  ;;  %v45_v42 = vld [vmem:[%s2649_s4 + $0x18] sm:$0xff]  ;;  %v773_v44 = vld [vmem:[%s2648_s2 + $0x28] sm:$0xff]  ;;  %v46_v46 = vld [vmem:[%s2649_s4 + $0x20] sm:$0x1f] }
   0xc   :  { %1731 = vmatpush3.bf16.xpose.msk.msra.mxu0 %vm2036_vm1, %v1729_v8  ;;  %637 = vperm.xlu0 %1905, %v61_v17   ;;  %v1821_v45 = vpack.c.bf16 %v773_v44, %v772_v43  ;;  %v774_v47 = vld [vmem:[%s2648_s2 + $0x30] sm:$0xff]  ;;  %v775_v48 = vld [vmem:[%s2648_s2 + $0x38] sm:$0xff]  ;;  %v776_v50 = vld [vmem:[%s2648_s2 + $0x40] sm:$0xff] }
   0xd   :  { %1732 = vmatprep.subr.bf16.mxu0 %v1947_v0  ;;  %v1825_v49 = vpack.c.bf16 %v775_v48, %v774_v47  ;;  %v777_v51 = vld [vmem:[%s2648_s2 + $0x48] sm:$0xff]  ;;  %v778_v53 = vld [vmem:[%s2648_s2 + $0x50] sm:$0xff]  ;;  %v779_v54 = vld [vmem:[%s2648_s2 + $0x58] sm:$0xff] }
   0xe   :  { %v1829_v52 = vpack.c.bf16 %v777_v51, %v776_v50  ;;  %v1833_v55 = vpack.c.bf16 %v779_v54, %v778_v53  ;;  %v780_v56 = vld [vmem:[%s2648_s2 + $0x60] sm:$0xff]  ;;  %v781_v57 = vld [vmem:[%s2648_s2 + $0x68] sm:$0xff]  ;;  %v782_v59 = vld [vmem:[%s2648_s2 + $0x70] sm:$0xff] }
   0xf   :  { %v1837_v58 = vpack.c.bf16 %v781_v57, %v780_v56  ;;  %v783_v60 = vld [vmem:[%s2648_s2 + $0x78] sm:$0xff]  ;;  %v2240_v62 = vld [vmem:[%s2650_s5] sm:$0xff]  ;;  %v79_v57 = vld [vmem:[%s2651_s1 + $0x8] sm:$0xff] }
  0x10   :  { %v1841_v61 = vpack.c.bf16 %v783_v60, %v782_v59  ;;  %1637 = vmatprep.mubr.msk.f32.mxu1 %vm327_vm3, %v2240_v62  ;;  %vm2273_vm8 = vmpackc.low %vm411_vm7, %vm411_vm7 }
  0x11   :  { %vm2435_vm13 = vmpackc.low %vm551_vm11, %vm1951_vm12 }
  0x14   :  { %1735 = vmatpush3.bf16.xpose.msk.msra.mxu0 %vm2036_vm1, %v1733_v15 }
  0x15   :  { %1736 = vmatprep.subr.bf16.mxu0 %v1947_v0 }
  0x1c   :  { %1739 = vmatpush3.bf16.xpose.msk.msra.mxu0 %vm2036_vm1, %v1737_v20 }
  0x1d   :  { %1740 = vmatprep.subr.bf16.mxu0 %v1947_v0 }
  0x24   :  { %1743 = vmatpush3.bf16.xpose.msk.msra.mxu0 %vm2036_vm1, %v1741_v23 }
  0x25   :  { %1744 = vmatprep.subr.bf16.mxu0 %v1947_v0 }
  0x2c   :  { %1747 = vmatpush3.bf16.xpose.msk.msra.mxu0 %vm2036_vm1, %v1745_v26 }
  0x2d   :  { %1748 = vmatprep.subr.bf16.mxu0 %v1947_v0 }
  0x34   :  { %1751 = vmatpush3.bf16.xpose.msk.msra.mxu0 %vm2036_vm1, %v1749_v29 }
  0x35   :  { %1752 = vmatprep.subr.bf16.mxu0 %v1947_v0 }
  0x3c   :  { %1755 = vmatpush3.bf16.xpose.msk.msra.mxu0 %vm2036_vm1, %v1753_v32 }
  0x3d   :  { %1812 = vmatprep.subr.bf16.mxu0 %v1947_v0 }
  0x43   :  { %1617 = vmatmul.mubr.msk.f32.vlgmr.msra.gmra.mrb[0].mxu0 %vm110_vm0, %v42_v35 }
  0x44   :  { %1815 = vmatpush3.bf16.xpose.msk.msra.mxu0 %vm2036_vm1, %v1813_v36  ;;  %1619 = vmatprep.mubr.msk.f32.mxu0 %vm1948_vm2, %v1949_v4 }
  0x45   :  { %1816 = vmatprep.subr.bf16.mxu0 %v1947_v0 }
  0x47   :  { %1620 = vmatmul.mubr.msk.f32.gmra.mrb[2].mxu0 %vm110_vm0, %v43_v37 }
  0x48   :  { %1622 = vmatprep.mubr.msk.f32.mxu0 %vm1948_vm2, %v1949_v4 }
  0x4b   :  { %1623 = vmatmul.mubr.msk.f32.gmra.mrb[4].mxu0 %vm110_vm0, %v44_v40 }
  0x4c   :  { %1819 = vmatpush3.bf16.xpose.msk.msra.mxu0 %vm2036_vm1, %v1817_v41  ;;  %1625 = vmatprep.mubr.msk.f32.mxu0 %vm1948_vm2, %v1949_v4 }
  0x4d   :  { %1820 = vmatprep.subr.bf16.mxu0 %v1947_v0 }
  0x4f   :  { %1626 = vmatmul.mubr.msk.f32.gmra.mrb[6].mxu0 %vm110_vm0, %v45_v42 }
  0x50   :  { %1628 = vmatprep.mubr.msk.f32.mxu0 %vm1948_vm2, %v1949_v4 }
  0x53   :  { %1629 = vmatmul.mubr.msk.f32.gmra.mrb[8].mxu0 %vm110_vm0, %v46_v46 }
  0x54   :  { %1823 = vmatpush3.bf16.xpose.msk.msra.mxu0 %vm2036_vm1, %v1821_v45  ;;  %1686 = vmatprep.mubr.msk.f32.mxu0 %vm1948_vm2, %v1949_v4 }
  0x55   :  { %1824 = vmatprep.subr.bf16.mxu0 %v1947_v0 }
  0x5c   :  { %1827 = vmatpush3.bf16.xpose.msk.msra.mxu0 %vm2036_vm1, %v1825_v49 }
  0x5d   :  { %1828 = vmatprep.subr.bf16.mxu0 %v1947_v0 }
  0x64   :  { %1831 = vmatpush3.bf16.xpose.msk.msra.mxu0 %vm2036_vm1, %v1829_v52 }
  0x65   :  { %1832 = vmatprep.subr.bf16.mxu0 %v1947_v0 }
  0x6c   :  { %1835 = vmatpush3.bf16.xpose.msk.msra.mxu0 %vm2036_vm1, %v1833_v55 }
  0x6d   :  { %1836 = vmatprep.subr.bf16.mxu0 %v1947_v0 }
  0x74   :  { %1839 = vmatpush3.bf16.xpose.msk.msra.mxu0 %vm2036_vm1, %v1837_v58  ;;  %v81_v58 = vld [vmem:[%s2651_s1 + $0x18] sm:$0xff] }
  0x75   :  { %1840 = vmatprep.subr.bf16.mxu0 %v1947_v0  ;;  %v1760_v60 = vpack.c.bf16 %v81_v58, %v79_v57  ;;  %v105_v57 = vld [vmem:[%s2651_s1 + $0xd8] sm:$0xff] }
  0x7c   :  { %1843 = vmatpush3.bf16.xpose.msk.msra.mxu0 %vm2036_vm1, %v1841_v61  ;;  %v2269_v61 = vld [vmem:[%s2650_s5 + $0x8] sm:$0x1f] }
  0x83   :  { %1687 = vmatmul.mubr.msk.f32.vlgmr.msra.gmra.mrb[10].mxu0 %vm110_vm0, %v42_v35  ;;  %v2244_v63 = vpop.permute.xlu0 %266 }
  0x84   :  { %1689 = vmatprep.mubr.msk.f32.mxu0 %vm1948_vm2, %v1949_v4  ;;  %v2250_v11 = vpop.permute.xlu1 %276 }
  0x87   :  { %1690 = vmatmul.mubr.msk.f32.gmra.mrb[12].mxu0 %vm110_vm0, %v43_v37  ;;  %v2247_v5 = vpop.permute.xlu0 %271 }
  0x88   :  { %1692 = vmatprep.mubr.msk.f32.mxu0 %vm1948_vm2, %v1949_v4 }
  0x8b   :  { %1693 = vmatmul.mubr.msk.f32.gmra.mrb[14].mxu0 %vm110_vm0, %v44_v40 }
  0x8c   :  { %1695 = vmatprep.mubr.msk.f32.mxu0 %vm1948_vm2, %v1949_v4 }
  0x8f   :  { %1696 = vmatmul.mubr.msk.f32.gmra.mrb[16].mxu0 %vm110_vm0, %v45_v42 }
  0x90   :  { %1698 = vmatprep.mubr.msk.f32.mxu0 %vm1948_vm2, %v1949_v4 }
  0x93   :  { %1699 = vmatmul.mubr.msk.f32.gmra.mrb[18].mxu0 %vm110_vm0, %v46_v46 }
 0x116   :  { %v240_v0 = vpop.f32.mrb[0].mxu0 }
 0x117   :  { %v282_v1 = vsub.f32 %v240_v0, %v2244_v63  ;;  %v1618_v2 = vpop.f32.mrb[1].mxu0  ;;  %v279_v45 = vmax.f32 %v240_v0, %v2244_v63 }
 0x118   :  { %v78_v2 = vld [vmem:[%s2651_s1] sm:$0xff] }
 0x119   :  { %v285_v3 = vand.u32 2147483647, %v282_v1  ;;  %v2280_v1 = vld [vmem:[%s2652_s6 + $0x8] sm:$0xff] }
 0x11a   :  { %v245_v4 = vpop.f32.mrb[2].mxu0 }
 0x11b   :  { %v288_v6 = vsub.f32 0.0, %v285_v3  ;;  %v283_v7 = vsub.f32 %v245_v4, %v2247_v5  ;;  %v1621_v8 = vpop.f32.mrb[3].mxu0  ;;  %v280_v46 = vmax.f32 %v245_v4, %v2247_v5  ;;  %v80_v3 = vld [vmem:[%s2651_s1 + $0x10] sm:$0xff]  ;;  %v83_v4 = vld [vmem:[%s2651_s1 + $0x28] sm:$0xff] }
 0x11d   :  { %v291_v9 = vmul.f32 1.442695, %v288_v6  ;;  %v286_v10 = vand.u32 2147483647, %v283_v7  ;;  %v85_v6 = vld [vmem:[%s2651_s1 + $0x38] sm:$0xff]  ;;  %v1763_v7 = vpack.c.bf16 %v80_v3, %v78_v2 }
 0x11e   :  { %v250_v12 = vpop.f32.mrb[4].mxu0  ;;  %v1765_v8 = vpack.c.bf16 %v85_v6, %v83_v4 }
 0x11f   :  { %1907 = vpow2.f32 %v291_v9  ;;  %v289_v13 = vsub.f32 0.0, %v286_v10  ;;  %v284_v14 = vsub.f32 %v250_v12, %v2250_v11  ;;  %v1624_v15 = vpop.f32.mrb[5].mxu0  ;;  %v281_v54 = vmax.f32 %v250_v12, %v2250_v11  ;;  %v82_v9 = vld [vmem:[%s2651_s1 + $0x20] sm:$0xff]  ;;  %v84_v10 = vld [vmem:[%s2651_s1 + $0x30] sm:$0xff]  ;;  %v87_v12 = vld [vmem:[%s2651_s1 + $0x48] sm:$0xff] }
 0x121   :  { %v293_v16 = vmul.f32 1.442695, %v289_v13  ;;  %v287_v17 = vand.u32 2147483647, %v284_v14  ;;  %v89_v13 = vld [vmem:[%s2651_s1 + $0x58] sm:$0xff]  ;;  %v1768_v14 = vpack.c.bf16 %v84_v10, %v82_v9  ;;  %v102_v9 = vld [vmem:[%s2651_s1 + $0xc0] sm:$0xff] }
 0x122   :  { %v2253_v18 = vpop.f32.mrb[6].mxu0  ;;  %v1770_v15 = vpack.c.bf16 %v89_v13, %v87_v12  ;;  %v104_v10 = vld [vmem:[%s2651_s1 + $0xd0] sm:$0xff]  ;;  %v107_v13 = vld [vmem:[%s2651_s1 + $0xe8] sm:$0xff] }
 0x123   :  { %1909 = vpow2.f32 %v293_v16  ;;  %v290_v19 = vsub.f32 0.0, %v287_v17  ;;  %v1627_v20 = vpop.f32.mrb[7].mxu0 }
 0x124   :  { %v86_v20 = vld [vmem:[%s2651_s1 + $0x40] sm:$0xff] }
 0x125   :  { %v295_v21 = vmul.f32 1.442695, %v290_v19 }
 0x126   :  { %v2255_v22 = vpop.f32.mrb[8].mxu0 }
 0x127   :  { %1911 = vpow2.f32 %v295_v21  ;;  %v1630_v23 = vpop.f32.mrb[9].mxu0  ;;  %v88_v21 = vld [vmem:[%s2651_s1 + $0x50] sm:$0xff] }
 0x128   :  { %v91_v23 = vld [vmem:[%s2651_s1 + $0x68] sm:$0xff] }
 0x129   :  { %v1908_v24 = vpop.eup %1907 }
 0x12a   :  { %v297_v25 = vadd.f32 1.0, %v1908_v24  ;;  %v300_v29 = vmul.f32 -0.5, %v1908_v24  ;;  %v303_v34 = vand.u32 2147483647, %v1908_v24 }
 0x12c   :  { %1913 = vlog2.f32 %v297_v25  ;;  %v301_v32 = vadd.f32 1.0, %v300_v29  ;;  %vm304_vm4 = vcmp.lt.f32.partialorder %v303_v34, 0.0004427343 }
 0x12d   :  { %v1910_v26 = vpop.eup %1909 }
 0x12e   :  { %v306_v27 = vadd.f32 1.0, %v1910_v26  ;;  %v309_v31 = vmul.f32 -0.5, %v1910_v26  ;;  %v312_v38 = vand.u32 2147483647, %v1910_v26  ;;  %v302_v39 = vmul.f32 %v1908_v24, %v301_v32  ;;  %v93_v24 = vld [vmem:[%s2651_s1 + $0x78] sm:$0xff] }
 0x130   :  { %1915 = vlog2.f32 %v306_v27  ;;  %v310_v37 = vadd.f32 1.0, %v309_v31  ;;  %vm313_vm5 = vcmp.lt.f32.partialorder %v312_v38, 0.0004427343  ;;  %v1773_v27 = vpack.c.bf16 %v88_v21, %v86_v20 }
 0x131   :  { %v1912_v28 = vpop.eup %1911  ;;  %v1775_v31 = vpack.c.bf16 %v93_v24, %v91_v23 }
 0x132   :  { %v315_v30 = vadd.f32 1.0, %v1912_v28  ;;  %v318_v35 = vmul.f32 -0.5, %v1912_v28  ;;  %v311_v44 = vmul.f32 %v1910_v26, %v310_v37  ;;  %v321_v47 = vand.u32 2147483647, %v1912_v28  ;;  %v92_v37 = vld [vmem:[%s2651_s1 + $0x70] sm:$0xff] }
 0x134   :  { %1917 = vlog2.f32 %v315_v30  ;;  %v319_v41 = vadd.f32 1.0, %v318_v35  ;;  %vm322_vm6 = vcmp.lt.f32.partialorder %v321_v47, 0.0004427343  ;;  %v101_v47 = vld [vmem:[%s2651_s1 + $0xb8] sm:$0xff] }
 0x136   :  { %v1914_v33 = vpop.eup %1913  ;;  %v320_v53 = vmul.f32 %v1912_v28, %v319_v41 }
 0x137   :  { %v299_v36 = vmul.f32 0.6931472, %v1914_v33 }
 0x139   :  { %v305_v42 = vsel %vm304_vm4, %v302_v39, %v299_v36  ;;  %v90_v36 = vld [vmem:[%s2651_s1 + $0x60] sm:$0xff]  ;;  %v95_v39 = vld [vmem:[%s2651_s1 + $0x88] sm:$0xff] }
 0x13a   :  { %v1916_v40 = vpop.eup %1915  ;;  %v324_v50 = vadd.f32 %v305_v42, %v279_v45  ;;  %v1778_v42 = vpack.c.bf16 %v92_v37, %v90_v36  ;;  %v96_v45 = vld [vmem:[%s2651_s1 + $0x90] sm:$0xff] }
 0x13b   :  { %v308_v43 = vmul.f32 0.6931472, %v1916_v40  ;;  %v97_v40 = vld [vmem:[%s2651_s1 + $0x98] sm:$0xff] }
 0x13d   :  { %v314_v48 = vsel %vm313_vm5, %v311_v44, %v308_v43  ;;  %v1780_v43 = vpack.c.bf16 %v97_v40, %v95_v39  ;;  %v94_v44 = vld [vmem:[%s2651_s1 + $0x80] sm:$0xff]  ;;  %v2449_v40 = vld [vmem:[%s2653_s7 + $0x8] sm:$0x1f] }
 0x13e   :  { %v1918_v49 = vpop.eup %1917  ;;  %v325_v51 = vadd.f32 %v314_v48, %v280_v46  ;;  %v99_v46 = vld [vmem:[%s2651_s1 + $0xa8] sm:$0xff] }
 0x13f   :  { %v317_v52 = vmul.f32 0.6931472, %v1918_v49 }
 0x140   :  { %v1756_v55 = vpack.c.bf16 %v325_v51, %v324_v50  ;;  %v1783_v50 = vpack.c.bf16 %v96_v45, %v94_v44  ;;  %v1785_v51 = vpack.c.bf16 %v101_v47, %v99_v46 }
 0x141   :  { %v323_v56 = vsel %vm322_vm6, %v320_v53, %v317_v52 }
 0x142   :  { %v326_v59 = vadd.f32 %v323_v56, %v281_v54  ;;  %1757 = vmatprep.subr.bf16.mxu1 %v1756_v55  ;;  %v98_v54 = vld [vmem:[%s2651_s1 + $0xa0] sm:$0xff]  ;;  %v103_v56 = vld [vmem:[%s2651_s1 + $0xc8] sm:$0xff] }
 0x143   :  { %1759 = vmatpush3.bf16.msra.mxu1 %v1756_v55  ;;  %v100_v55 = vld [vmem:[%s2651_s1 + $0xb0] sm:$0xff]  ;;  %v1790_v2 = vpack.c.bf16 %v105_v57, %v103_v56 }
 0x144   :  { %1635 = vmatprep.subr.mxu1 %v326_v59 }
 0x147   :  { %1636 = vmatpush3.msra.mxu1 %v326_v59  ;;  %v1788_v59 = vpack.c.bf16 %v100_v55, %v98_v54 }
 0x148   :  { %1638 = vmatmul.mubr.msk.f32.vlgmr.msra.gmra.mrb[0].mxu1 %vm327_vm3, %v2269_v61  ;;  %1762 = vmatprep.subr.msk.bf16.mxu1 %vm2273_vm8, %v1760_v60 }
 0x149   :  { %1461 = vmatprep.mubr.msk.f32.mxu1 %vm411_vm7, %v2280_v1 }
 0x14e   :  { %1764 = vmatpush1.bf16.xpose.msra.mxu1 %v1763_v7 }
 0x14f   :  { %1767 = vmatprep.subr.msk.bf16.mxu1 %vm2273_vm8, %v1765_v8 }
 0x156   :  { %1769 = vmatpush1.bf16.xpose.msra.mxu1 %v1768_v14  ;;  %v2314_v16 = vpop.f32.mrb[10].mxu0  ;;  %v109_v14 = vld [vmem:[%s2651_s1 + $0xf8] sm:$0xff] }
 0x157   :  { %v957_v17 = vsub.f32 %v2314_v16, %v2244_v63  ;;  %v1688_v19 = vpop.f32.mrb[11].mxu0  ;;  %1772 = vmatprep.subr.msk.bf16.mxu1 %vm2273_vm8, %v1770_v15  ;;  %v1795_v24 = vpack.c.bf16 %v109_v14, %v107_v13 }
 0x158   :  { %v1793_v19 = vpack.c.bf16 %v104_v10, %v102_v9 }
 0x159   :  { %v960_v25 = vand.u32 2147483647, %v957_v17 }
 0x15a   :  { %v2332_v26 = vpop.f32.mrb[12].mxu0 }
 0x15b   :  { %v963_v28 = vsub.f32 0.0, %v960_v25  ;;  %v958_v29 = vsub.f32 %v2332_v26, %v2247_v5  ;;  %v1691_v30 = vpop.f32.mrb[13].mxu0  ;;  %v954_v25 = vmax.f32 %v2314_v16, %v2244_v63 }
 0x15d   :  { %v966_v32 = vmul.f32 1.442695, %v963_v28  ;;  %v961_v33 = vand.u32 2147483647, %v958_v29 }
 0x15e   :  { %1774 = vmatpush1.bf16.xpose.msra.mxu1 %v1773_v27  ;;  %v2336_v34 = vpop.f32.mrb[14].mxu0  ;;  %v955_v27 = vmax.f32 %v2332_v26, %v2247_v5  ;;  %v2411_v5 = vld [vmem:[%s2652_s6] sm:$0xff]  ;;  %v2416_v26 = vld [vmem:[%s2652_s6 + $0x18] sm:$0x1f] }
 0x15f   :  { %1919 = vpow2.f32 %v966_v32  ;;  %v964_v35 = vsub.f32 0.0, %v961_v33  ;;  %1777 = vmatprep.subr.msk.bf16.mxu1 %vm2273_vm8, %v1775_v31  ;;  %v1694_v38 = vpop.f32.mrb[15].mxu0  ;;  %v106_v31 = vld [vmem:[%s2651_s1 + $0xe0] sm:$0xff]  ;;  %v108_v32 = vld [vmem:[%s2651_s1 + $0xf0] sm:$0xff] }
 0x160   :  { %v1798_v16 = vpack.c.bf16 %v108_v32, %v106_v31  ;;  %v2424_v33 = vld [vmem:[%s2652_s6 + $0x10] sm:$0x1f] }
 0x161   :  { %v968_v41 = vmul.f32 1.442695, %v964_v35  ;;  %v53_v35 = vld [vmem:[%s2653_s7] sm:$0xff] }
 0x162   :  { %1714 = vmatprep.mubr.msk.f32.mxu0 %vm110_vm0, %v53_v35 }
 0x163   :  { %1921 = vpow2.f32 %v968_v41 }
 0x166   :  { %1779 = vmatpush1.bf16.xpose.msra.mxu1 %v1778_v42 }
 0x167   :  { %1782 = vmatprep.subr.msk.bf16.mxu1 %vm2273_vm8, %v1780_v43 }
 0x169   :  { %v1920_v48 = vpop.eup %1919 }
 0x16a   :  { %v972_v49 = vadd.f32 1.0, %v1920_v48  ;;  %v975_v58 = vmul.f32 -0.5, %v1920_v48  ;;  %v978_v6 = vand.u32 2147483647, %v1920_v48 }
 0x16c   :  { %1923 = vlog2.f32 %v972_v49  ;;  %v976_v3 = vadd.f32 1.0, %v975_v58  ;;  %vm979_vm9 = vcmp.lt.f32.partialorder %v978_v6, 0.0004427343  ;;  %v2458_v49 = vld [vmem:[%s2655_s8] sm:$0xff]  ;;  %v959_v58 = vsub.f32 %v2336_v34, %v2250_v11 }
 0x16d   :  { %v1922_v52 = vpop.eup %1921 }
 0x16e   :  { %v981_v53 = vadd.f32 1.0, %v1922_v52  ;;  %1784 = vmatpush1.bf16.xpose.msra.mxu1 %v1783_v50  ;;  %v984_v60 = vmul.f32 -0.5, %v1922_v52  ;;  %v987_v12 = vand.u32 2147483647, %v1922_v52  ;;  %v977_v15 = vmul.f32 %v1920_v48, %v976_v3  ;;  %v2462_v50 = vpop.permute.xlu0 %637 }
 0x16f   :  { %1787 = vmatprep.subr.msk.bf16.mxu1 %vm2273_vm8, %v1785_v51  ;;  %v2464_v51 = vpop.permute.xlu1 %632 }
 0x170   :  { %1925 = vlog2.f32 %v981_v53  ;;  %v985_v8 = vadd.f32 1.0, %v984_v60  ;;  %vm988_vm10 = vcmp.lt.f32.partialorder %v987_v12, 0.0004427343 }
 0x172   :  { %v986_v23 = vmul.f32 %v1922_v52, %v985_v8 }
 0x176   :  { %v1924_v4 = vpop.eup %1923  ;;  %1789 = vmatpush1.bf16.xpose.msra.mxu1 %v1788_v59  ;;  %v962_v59 = vand.u32 2147483647, %v959_v58  ;;  %v786_v58 = vld [vmem:[%s2656_s3 + $0x10] sm:$0xff] }
 0x177   :  { %v974_v7 = vmul.f32 0.6931472, %v1924_v4  ;;  %1792 = vmatprep.subr.msk.bf16.mxu1 %vm2273_vm8, %v1790_v2 }
 0x178   :  { %v965_v60 = vsub.f32 0.0, %v962_v59 }
 0x179   :  { %v980_v20 = vsel %vm979_vm9, %v977_v15, %v974_v7 }
 0x17a   :  { %v1926_v17 = vpop.eup %1925  ;;  %v999_v29 = vadd.f32 %v980_v20, %v954_v25  ;;  %v970_v4 = vmul.f32 1.442695, %v965_v60 }
 0x17b   :  { %v983_v21 = vmul.f32 0.6931472, %v1926_v17 }
 0x17d   :  { %v989_v28 = vsel %vm988_vm10, %v986_v23, %v983_v21 }
 0x17e   :  { %v1000_v30 = vadd.f32 %v989_v28, %v955_v27  ;;  %1794 = vmatpush1.bf16.xpose.msra.mxu1 %v1793_v19 }
 0x17f   :  { %1797 = vmatprep.subr.msk.bf16.mxu1 %vm2273_vm8, %v1795_v24 }
 0x180   :  { %v2406_v63 = vpack.c.bf16 %v1000_v30, %v999_v29 }
 0x186   :  { %1799 = vmatpush1.bf16.xpose.msra.mxu1 %v1798_v16 }
 0x18d   :  { %531 = vmatmul.mubr.f32.vlgmr.msra.gmra.mrb[2].mxu1 %v2411_v5 }
 0x18e   :  { %1462 = vmatprep.mubr.msk.f32.mxu1 %vm411_vm7, %v2416_v26 }
 0x191   :  { %536 = vmatmul.mubr.f32.gmra.mrb[4].mxu1 %v2424_v33 }
 0x192   :  { %1644 = vmatprep.mubr.msk.f32.mxu1 %vm110_vm0, %v53_v35 }
 0x21b   :  { %v1639_v36 = vpop.f32.mrb[0].mxu1 }
 0x21c   :  { %410 = vst [vmem:[%s2654_s11 + $0x8] sm:$0x1f] %v1639_v36  ;;  %v400_v37 = vpop.f32.mrb[1].mxu1 }
 0x21d   :  { %409 = vst [vmem:[%s2654_s11] sm:$0xff] %v400_v37  ;;  %v1800_v39 = vpack.c.bf16 %v1639_v36, %v400_v37 }
 0x21f   :  { %1802 = vmatprep.subr.msk.bf16.mxu1 %vm2435_vm13, %v1800_v39 }
 0x220   :  { %1805 = vmatpush3.bf16.msk.msra.mxu1 %vm2435_vm13, %v1800_v39 }
 0x223   :  { %1645 = vmatmul.mubr.msk.f32.vlgmr.msra.gmra.mrb[6].mxu1 %vm110_vm0, %v2449_v40 }
 0x224   :  { %1651 = vmatprep.mubr.msk.f32.mxu1 %vm110_vm0, %v2458_v49 }
 0x260   :  { %v532_v41 = vpop.f32.mrb[2].mxu1 }
 0x261   :  { %v541_v42 = vmul.f32 0.5, %v532_v41  ;;  %v534_v43 = vpop.f32.mrb[3].mxu1 }
 0x263   :  { %v543_v44 = vadd.f32 %v541_v42, %v2253_v18 }
 0x264   :  { %v537_v45 = vpop.f32.mrb[4].mxu1 }
 0x265   :  { %v542_v46 = vmul.f32 0.5, %v537_v45  ;;  %v539_v47 = vpop.f32.mrb[5].mxu1  ;;  %v642_v18 = vsub.f32 %v543_v44, %v2464_v51  ;;  %v640_v30 = vmax.f32 %v543_v44, %v2464_v51 }
 0x267   :  { %v544_v48 = vadd.f32 %v542_v46, %v2255_v22  ;;  %v644_v54 = vand.u32 2147483647, %v642_v18 }
 0x269   :  { %v643_v52 = vsub.f32 %v544_v48, %v2462_v50  ;;  %v646_v22 = vsub.f32 0.0, %v644_v54  ;;  %v641_v28 = vmax.f32 %v544_v48, %v2462_v50  ;;  %v2479_v54 = vld [vmem:[%s2655_s8 + $0x8] sm:$0x1f] }
 0x26b   :  { %v645_v53 = vand.u32 2147483647, %v643_v52  ;;  %v648_v57 = vmul.f32 1.442695, %v646_v22  ;;  %v785_v22 = vld [vmem:[%s2656_s3 + $0x8] sm:$0xff] }
 0x26d   :  { %v647_v55 = vsub.f32 0.0, %v645_v53 }
 0x26f   :  { %v650_v56 = vmul.f32 1.442695, %v647_v55  ;;  %v956_v55 = vmax.f32 %v2336_v34, %v2250_v11  ;;  %v784_v34 = vld [vmem:[%s2656_s3] sm:$0xff] }
 0x270   :  { %v1851_v59 = vpack.c.bf16 %v786_v58, %v784_v34 }
 0x271   :  { %1927 = vpow2.f32 %v650_v56  ;;  %v787_v56 = vld [vmem:[%s2656_s3 + $0x18] sm:$0xff] }
 0x272   :  { %1929 = vpow2.f32 %v648_v57  ;;  %v1848_v11 = vpack.c.bf16 %v787_v56, %v785_v22 }
 0x273   :  { %1931 = vpow2.f32 %v970_v4 }
 0x27b   :  { %v1928_v2 = vpop.eup %1927 }
 0x27c   :  { %v1930_v3 = vpop.eup %1929  ;;  %v661_v6 = vadd.f32 1.0, %v1928_v2  ;;  %v664_v8 = vmul.f32 -0.5, %v1928_v2  ;;  %v667_v17 = vand.u32 2147483647, %v1928_v2 }
 0x27d   :  { %v652_v7 = vadd.f32 1.0, %v1930_v3  ;;  %v1932_v9 = vpop.eup %1931  ;;  %v655_v10 = vmul.f32 -0.5, %v1930_v3  ;;  %v658_v21 = vand.u32 2147483647, %v1930_v3 }
 0x27e   :  { %1933 = vlog2.f32 %v661_v6  ;;  %v990_v14 = vadd.f32 1.0, %v1932_v9  ;;  %v665_v15 = vadd.f32 1.0, %v664_v8  ;;  %vm668_vm14 = vcmp.lt.f32.partialorder %v667_v17, 0.0004427343  ;;  %v794_v8 = vld [vmem:[%s2656_s3 + $0x50] sm:$0xff]  ;;  %v801_v17 = vld [vmem:[%s2656_s3 + $0x88] sm:$0xff] }
 0x27f   :  { %1935 = vlog2.f32 %v652_v7  ;;  %v656_v19 = vadd.f32 1.0, %v655_v10  ;;  %vm659_vm15 = vcmp.lt.f32.partialorder %v658_v21, 0.0004427343  ;;  %v993_v16 = vmul.f32 -0.5, %v1932_v9  ;;  %v792_v7 = vld [vmem:[%s2656_s3 + $0x40] sm:$0xff]  ;;  %v799_v10 = vld [vmem:[%s2656_s3 + $0x78] sm:$0xff] }
 0x280   :  { %1937 = vlog2.f32 %v990_v14  ;;  %v666_v24 = vmul.f32 %v1928_v2, %v665_v15  ;;  %v996_v47 = vand.u32 2147483647, %v1932_v9  ;;  %v790_v2 = vld [vmem:[%s2656_s3 + $0x30] sm:$0xff]  ;;  %v796_v14 = vld [vmem:[%s2656_s3 + $0x60] sm:$0xff] }
 0x281   :  { %v657_v25 = vmul.f32 %v1930_v3, %v656_v19  ;;  %v994_v45 = vadd.f32 1.0, %v993_v16  ;;  %v793_v3 = vld [vmem:[%s2656_s3 + $0x48] sm:$0xff]  ;;  %v798_v15 = vld [vmem:[%s2656_s3 + $0x70] sm:$0xff]  ;;  %v803_v19 = vld [vmem:[%s2656_s3 + $0x98] sm:$0xff] }
 0x282   :  { %vm997_vm1 = vcmp.lt.f32.partialorder %v996_v47, 0.0004427343  ;;  %v1868_v21 = vpack.c.bf16 %v803_v19, %v801_v17  ;;  %v811_v16 = vld [vmem:[%s2656_s3 + $0xd8] sm:$0xff]  ;;  %v814_v47 = vld [vmem:[%s2656_s3 + $0xf0] sm:$0xff] }
 0x283   :  { %v995_v48 = vmul.f32 %v1932_v9, %v994_v45  ;;  %v797_v9 = vld [vmem:[%s2656_s3 + $0x68] sm:$0xff] }
 0x288   :  { %v1934_v12 = vpop.eup %1933 }
 0x289   :  { %v1936_v13 = vpop.eup %1935  ;;  %v663_v20 = vmul.f32 0.6931472, %v1934_v12  ;;  %v1861_v12 = vpack.c.bf16 %v794_v8, %v792_v7 }
 0x28a   :  { %v654_v23 = vmul.f32 0.6931472, %v1936_v13  ;;  %v1938_v41 = vpop.eup %1937  ;;  %v1863_v13 = vpack.c.bf16 %v799_v10, %v797_v9 }
 0x28b   :  { %v669_v27 = vsel %vm668_vm14, %v666_v24, %v663_v20  ;;  %v992_v18 = vmul.f32 0.6931472, %v1938_v41  ;;  %v1866_v20 = vpack.c.bf16 %v798_v15, %v796_v14  ;;  %v802_v24 = vld [vmem:[%s2656_s3 + $0x90] sm:$0xff]  ;;  %v813_v41 = vld [vmem:[%s2656_s3 + $0xe8] sm:$0xff] }
 0x28c   :  { %v660_v29 = vsel %vm659_vm15, %v657_v25, %v654_v23  ;;  %v671_v31 = vadd.f32 %v669_v27, %v641_v28  ;;  %v800_v23 = vld [vmem:[%s2656_s3 + $0x80] sm:$0xff]  ;;  %v805_v25 = vld [vmem:[%s2656_s3 + $0xa8] sm:$0xff]  ;;  %v807_v27 = vld [vmem:[%s2656_s3 + $0xb8] sm:$0xff] }
 0x28d   :  { %v670_v32 = vadd.f32 %v660_v29, %v640_v30  ;;  %v998_v44 = vsel %vm997_vm1, %v995_v48, %v992_v18  ;;  %v1871_v28 = vpack.c.bf16 %v802_v24, %v800_v23  ;;  %v1873_v29 = vpack.c.bf16 %v807_v27, %v805_v25  ;;  %v804_v30 = vld [vmem:[%s2656_s3 + $0xa0] sm:$0xff]  ;;  %v945_v18 = vpop.f32.mrb[16].mxu0 }
 0x28e   :  { %v673_v36 = vmul.f32 2.0, %v671_v31  ;;  %v1001_v57 = vadd.f32 %v998_v44, %v956_v55  ;;  %v806_v31 = vld [vmem:[%s2656_s3 + $0xb0] sm:$0xff]  ;;  %v1697_v0 = vpop.f32.mrb[17].mxu0 }
 0x28f   :  { %v672_v42 = vmul.f32 2.0, %v670_v32  ;;  %v809_v32 = vld [vmem:[%s2656_s3 + $0xc8] sm:$0xff] }
 0x2f6   :  { %v1646_v35 = vpop.f32.mrb[6].mxu1 }
 0x2f7   :  { %v675_v37 = vmul.f32 2.0, %v1646_v35  ;;  %v621_v39 = vpop.f32.mrb[7].mxu1  ;;  %v1876_v35 = vpack.c.bf16 %v806_v31, %v804_v30 }
 0x2f8   :  { %v674_v43 = vmul.f32 2.0, %v621_v39  ;;  %v810_v39 = vld [vmem:[%s2656_s3 + $0xd0] sm:$0xff] }
 0x2f9   :  { %v677_v46 = vsub.f32 %v673_v36, %v675_v37  ;;  %v1878_v36 = vpack.c.bf16 %v811_v16, %v809_v32  ;;  %v808_v37 = vld [vmem:[%s2656_s3 + $0xc0] sm:$0xff] }
 0x2fa   :  { %v676_v52 = vsub.f32 %v672_v42, %v674_v43  ;;  %v815_v42 = vld [vmem:[%s2656_s3 + $0xf8] sm:$0xff]  ;;  %v1881_v43 = vpack.c.bf16 %v810_v39, %v808_v37 }
 0x2fb   :  { %v1883_v45 = vpack.c.bf16 %v815_v42, %v813_v41 }
 0x2fc   :  { %v1806_v53 = vpack.c.bf16 %v677_v46, %v676_v52  ;;  %v812_v46 = vld [vmem:[%s2656_s3 + $0xe0] sm:$0xff] }
 0x2fd   :  { %v1886_v52 = vpack.c.bf16 %v814_v47, %v812_v46 }
 0x2fe   :  { %1808 = vmatprep.subr.msk.bf16.mxu1 %vm2435_vm13, %v1806_v53 }
 0x2ff   :  { %1811 = vmatpush3.bf16.msk.msra.mxu1 %vm2435_vm13, %v1806_v53  ;;  %v950_v53 = vpop.f32.mrb[18].mxu0 }
 0x300   :  { %1845 = vmatprep.subr.bf16.mxu1 %v2406_v63  ;;  %v1700_v48 = vpop.f32.mrb[19].mxu0 }
 0x302   :  { %1652 = vmatmul.mubr.msk.f32.vlgmr.msra.gmra.mrb[8].mxu1 %vm110_vm0, %v2479_v54 }
 0x303   :  { %1847 = vmatpush3.bf16.msra.mxu1 %v2406_v63  ;;  %1707 = vmatprep.mubr.msk.f32.mxu1 %vm327_vm3, %v2240_v62  ;;  %v789_v62 = vld [vmem:[%s2656_s3 + $0x28] sm:$0xff]  ;;  %v791_v63 = vld [vmem:[%s2656_s3 + $0x38] sm:$0xff] }
 0x304   :  { %1705 = vmatprep.subr.mxu1 %v1001_v57  ;;  %v1853_v60 = vpack.c.bf16 %v791_v63, %v789_v62 }
 0x307   :  { %1706 = vmatpush3.msra.mxu1 %v1001_v57 }
 0x308   :  { %1708 = vmatmul.mubr.msk.f32.vlgmr.msra.gmra.mrb[10].mxu1 %vm327_vm3, %v2269_v61  ;;  %1850 = vmatprep.subr.msk.bf16.mxu1 %vm2273_vm8, %v1848_v11  ;;  %v788_v61 = vld [vmem:[%s2656_s3 + $0x20] sm:$0xff] }
 0x309   :  { %1508 = vmatprep.mubr.msk.f32.mxu1 %vm411_vm7, %v2280_v1  ;;  %v795_v1 = vld [vmem:[%s2656_s3 + $0x58] sm:$0xff]  ;;  %v1856_v4 = vpack.c.bf16 %v790_v2, %v788_v61 }
 0x30a   :  { %v1858_v6 = vpack.c.bf16 %v795_v1, %v793_v3 }
 0x30e   :  { %1852 = vmatpush1.bf16.xpose.msra.mxu1 %v1851_v59 }
 0x30f   :  { %1855 = vmatprep.subr.msk.bf16.mxu1 %vm2273_vm8, %v1853_v60 }
 0x316   :  { %1857 = vmatpush1.bf16.xpose.msra.mxu1 %v1856_v4 }
 0x317   :  { %1860 = vmatprep.subr.msk.bf16.mxu1 %vm2273_vm8, %v1858_v6 }
 0x31e   :  { %1862 = vmatpush1.bf16.xpose.msra.mxu1 %v1861_v12 }
 0x31f   :  { %1865 = vmatprep.subr.msk.bf16.mxu1 %vm2273_vm8, %v1863_v13 }
 0x326   :  { %1867 = vmatpush1.bf16.xpose.msra.mxu1 %v1866_v20 }
 0x327   :  { %1870 = vmatprep.subr.msk.bf16.mxu1 %vm2273_vm8, %v1868_v21 }
 0x32e   :  { %1872 = vmatpush1.bf16.xpose.msra.mxu1 %v1871_v28 }
 0x32f   :  { %1875 = vmatprep.subr.msk.bf16.mxu1 %vm2273_vm8, %v1873_v29 }
 0x336   :  { %1877 = vmatpush1.bf16.xpose.msra.mxu1 %v1876_v35 }
 0x337   :  { %1880 = vmatprep.subr.msk.bf16.mxu1 %vm2273_vm8, %v1878_v36 }
 0x33e   :  { %1882 = vmatpush1.bf16.xpose.msra.mxu1 %v1881_v43 }
 0x33f   :  { %1885 = vmatprep.subr.msk.bf16.mxu1 %vm2273_vm8, %v1883_v45 }
 0x346   :  { %1887 = vmatpush1.bf16.xpose.msra.mxu1 %v1886_v52 }
 0x34d   :  { %1192 = vmatmul.mubr.f32.vlgmr.msra.gmra.mrb[12].mxu1 %v2411_v5 }
 0x34e   :  { %1509 = vmatprep.mubr.msk.f32.mxu1 %vm411_vm7, %v2416_v26 }
 0x351   :  { %1197 = vmatmul.mubr.f32.gmra.mrb[14].mxu1 %v2424_v33 }
 0x3d5   :  { %v1653_v44 = vpop.f32.mrb[8].mxu1 }
 0x3d6   :  { %v763_v55 = vmax.f32 %v1653_v44, 1.0  ;;  %v753_v22 = vpop.f32.mrb[9].mxu1 }
 0x3d7   :  { %v762_v56 = vmax.f32 %v753_v22, 1.0 }
 0x3d8   :  { %v765_v57 = vadd.f32 0.01, %v763_v55 }
 0x3d9   :  { %v764_v11 = vadd.f32 0.01, %v762_v56 }
 0x3da   :  { %767 = vst [vmem:[%s2657_s12 + $0x8] sm:$0x1f] %v765_v57 }
 0x3db   :  { %766 = vst [vmem:[%s2657_s12] sm:$0xff] %v764_v11  ;;  %v1709_v5 = vpop.f32.mrb[10].mxu1 }
 0x3dc   :  { %1078 = vst [vmem:[%s2658_s13 + $0x8] sm:$0x1f] %v1709_v5  ;;  %v1068_v26 = vpop.f32.mrb[11].mxu1 }
 0x3dd   :  { %1077 = vst [vmem:[%s2658_s13] sm:$0xff] %v1068_v26  ;;  %v1888_v33 = vpack.c.bf16 %v1709_v5, %v1068_v26 }
 0x3df   :  { %1890 = vmatprep.subr.msk.bf16.mxu0 %vm2435_vm13, %v1888_v33 }
 0x3e0   :  { %1893 = vmatpush3.bf16.msk.msra.mxu0 %vm2435_vm13, %v1888_v33 }
 0x3e3   :  { %1715 = vmatmul.mubr.msk.f32.vlgmr.msra.gmra.mrb[20].mxu0 %vm110_vm0, %v2449_v40 }
 0x3e4   :  { %1721 = vmatprep.mubr.msk.f32.mxu0 %vm110_vm0, %v2458_v49 }
 0x420   :  { %v1193_v34 = vpop.f32.mrb[12].mxu1 }
 0x421   :  { %v1202_v58 = vmul.f32 0.5, %v1193_v34  ;;  %v1195_v62 = vpop.f32.mrb[13].mxu1 }
 0x423   :  { %v1204_v63 = vadd.f32 %v1202_v58, %v945_v18 }
 0x424   :  { %v1198_v59 = vpop.f32.mrb[14].mxu1 }
 0x425   :  { %v1203_v60 = vmul.f32 0.5, %v1198_v59  ;;  %v1200_v61 = vpop.f32.mrb[15].mxu1  ;;  %v1286_v1 = vsub.f32 %v1204_v63, %v2464_v51  ;;  %v1284_v16 = vmax.f32 %v1204_v63, %v2464_v51 }
 0x427   :  { %v1205_v2 = vadd.f32 %v1203_v60, %v950_v53  ;;  %v1288_v6 = vand.u32 2147483647, %v1286_v1 }
 0x429   :  { %v1287_v3 = vsub.f32 %v1205_v2, %v2462_v50  ;;  %v1290_v8 = vsub.f32 0.0, %v1288_v6  ;;  %v1285_v32 = vmax.f32 %v1205_v2, %v2462_v50 }
 0x42b   :  { %v1289_v4 = vand.u32 2147483647, %v1287_v3  ;;  %v1292_v9 = vmul.f32 1.442695, %v1290_v8 }
 0x42d   :  { %v1291_v7 = vsub.f32 0.0, %v1289_v4 }
 0x42f   :  { %v1294_v40 = vmul.f32 1.442695, %v1291_v7 }
 0x431   :  { %1939 = vpow2.f32 %v1294_v40 }
 0x432   :  { %1941 = vpow2.f32 %v1292_v9 }
 0x43b   :  { %v1940_v49 = vpop.eup %1939 }
 0x43c   :  { %v1942_v10 = vpop.eup %1941  ;;  %v1305_v12 = vadd.f32 1.0, %v1940_v49  ;;  %v1308_v14 = vmul.f32 -0.5, %v1940_v49  ;;  %v1311_v23 = vand.u32 2147483647, %v1940_v49 }
 0x43d   :  { %v1296_v13 = vadd.f32 1.0, %v1942_v10  ;;  %v1299_v15 = vmul.f32 -0.5, %v1942_v10  ;;  %v1302_v24 = vand.u32 2147483647, %v1942_v10 }
 0x43e   :  { %1943 = vlog2.f32 %v1305_v12  ;;  %v1309_v20 = vadd.f32 1.0, %v1308_v14  ;;  %vm1312_vm2 = vcmp.lt.f32.partialorder %v1311_v23, 0.0004427343 }
 0x43f   :  { %1945 = vlog2.f32 %v1296_v13  ;;  %v1300_v21 = vadd.f32 1.0, %v1299_v15  ;;  %vm1303_vm3 = vcmp.lt.f32.partialorder %v1302_v24, 0.0004427343 }
 0x440   :  { %v1310_v28 = vmul.f32 %v1940_v49, %v1309_v20 }
 0x441   :  { %v1301_v29 = vmul.f32 %v1942_v10, %v1300_v21 }
 0x448   :  { %v1944_v17 = vpop.eup %1943 }
 0x449   :  { %v1946_v19 = vpop.eup %1945  ;;  %v1307_v25 = vmul.f32 0.6931472, %v1944_v17 }
 0x44a   :  { %v1298_v27 = vmul.f32 0.6931472, %v1946_v19 }
 0x44b   :  { %v1313_v30 = vsel %vm1312_vm2, %v1310_v28, %v1307_v25 }
 0x44c   :  { %v1304_v31 = vsel %vm1303_vm3, %v1301_v29, %v1298_v27  ;;  %v1315_v35 = vadd.f32 %v1313_v30, %v1285_v32 }
 0x44d   :  { %v1314_v36 = vadd.f32 %v1304_v31, %v1284_v16 }
 0x44e   :  { %v1317_v39 = vmul.f32 2.0, %v1315_v35 }
 0x44f   :  { %v1316_v43 = vmul.f32 2.0, %v1314_v36 }
 0x4b6   :  { %v1716_v37 = vpop.f32.mrb[20].mxu0 }
 0x4b7   :  { %v1319_v41 = vmul.f32 2.0, %v1716_v37  ;;  %v1275_v42 = vpop.f32.mrb[21].mxu0 }
 0x4b8   :  { %v1318_v45 = vmul.f32 2.0, %v1275_v42 }
 0x4b9   :  { %v1321_v46 = vsub.f32 %v1317_v39, %v1319_v41 }
 0x4ba   :  { %v1320_v47 = vsub.f32 %v1316_v43, %v1318_v45 }
 0x4bc   :  { %v1894_v52 = vpack.c.bf16 %v1321_v46, %v1320_v47 }
 0x4be   :  { %1896 = vmatprep.subr.msk.bf16.mxu0 %vm2435_vm13, %v1894_v52 }
 0x4bf   :  { %1899 = vmatpush3.bf16.msk.msra.mxu0 %vm2435_vm13, %v1894_v52 }
 0x4c2   :  { %1722 = vmatmul.mubr.msk.f32.vlgmr.msra.gmra.mrb[22].mxu0 %vm110_vm0, %v2479_v54 }
 0x595   :  { %v1723_v50 = vpop.f32.mrb[22].mxu0 }
 0x596   :  { %v1401_v51 = vmax.f32 %v1723_v50, 1.0  ;;  %v1391_v18 = vpop.f32.mrb[23].mxu0 }
 0x597   :  { %v1400_v0 = vmax.f32 %v1391_v18, 1.0 }
 0x598   :  { %v1403_v53 = vadd.f32 0.01, %v1401_v51 }
 0x599   :  { %v1402_v48 = vadd.f32 0.01, %v1400_v0 }
 0x59a   :  { %1405 = vst [vmem:[%s2659_s14 + $0x8] sm:$0x1f] %v1403_v53 }
 0x59b   :  { %1404 = vst [vmem:[%s2659_s14] sm:$0xff] %v1402_v48 }

</bundles_post_ra>
